<compile_context>
chip_gen: v7x
topology: tpu7x:2x2x1
jax: 0.10.0
libtpu: 0.0.40
codegen_flags: <defaults>
</compile_context>

<pallas_src>
import functools

import jax
import jax.numpy as jnp
from jax.experimental import pallas as pl
from jax.experimental.pallas import tpu as pltpu

_LANES = 128
_MAX_BLOCK_ROWS = 4096   # 4096 x 128 f32 = 2 MiB per input block per step.


def _cdiv(a, b):
    return -(-a // b)


def _round_up(a, m):
    return _cdiv(a, m) * m


def _sublane_multiple(dtype):
    # Native tiling: (8,128) for 32-bit, (16,128) for 16-bit, (32,128) for 8-bit.
    return max(8, 32 // jnp.dtype(dtype).itemsize)


def _contrastive_loss_kernel(dist_ref, label_ref, out_ref, *,
                             margin, w0, w1, block_rows, valid_rows,
                             mask_tail):
    # dist_ref:  (block_rows, 128) distances, native float dtype
    # label_ref: (block_rows, 128) labels, native dtype
    # out_ref:   (1, 1) f32 per-block partial sum of loss2x
    dist = dist_ref[...].astype(jnp.float32)
    y = label_ref[...].astype(jnp.float32)          # is_genuine = label.float()

    hinge = jnp.maximum(margin - dist, 0.0)
    loss_genuine = y * (dist * dist)
    loss_imposter = (1.0 - y) * (hinge * hinge)
    if w1 != 1.0:   # weights folded statically; weight=None -> no extra ops
        loss_genuine = loss_genuine * w1
    if w0 != 1.0:
        loss_imposter = loss_imposter * w0
    per_elem = loss_genuine + loss_imposter

    if mask_tail:
        # The last block overruns the array; those rows hold unspecified VMEM
        # contents.  Select (not multiply) them away so NaN/Inf garbage can't
        # reach the reduction.
        step = pl.program_id(0)
        row = step * block_rows + jax.lax.broadcasted_iota(
            jnp.int32, per_elem.shape, 0)
        per_elem = jnp.where(row < valid_rows, per_elem, 0.0)

    out_ref[...] = jnp.sum(per_elem, keepdims=True)


def contrastive_loss(output, label, *, margin=1.0, weight=None,
                     max_block_rows=_MAX_BLOCK_ROWS):
    """Pallas-backed ContrastiveLoss forward.

    Args:
      output: distances, shape (N,) or (N, 1) (torch.squeeze semantics), float.
      label:  shape (N,) labels (1 = genuine, 0 = imposter); any numeric dtype.
      margin: contrastive margin (static Python float).
      weight: optional (w_imposter, w_genuine) static pair, or None.
      max_block_rows: tuning/testing knob for the per-step block height.
    Returns:
      scalar f32 loss = sum(y*D^2 + (1-y)*max(m-D,0)^2) / 2 / N.
    """
    dist = jnp.squeeze(jnp.asarray(output))
    if dist.ndim == 0:
        dist = dist.reshape(1)
    if dist.ndim != 1:
        raise ValueError(f"output must squeeze to 1-D, got shape {output.shape}")
    if not jnp.issubdtype(dist.dtype, jnp.floating):
        dist = dist.astype(jnp.float32)

    label = jnp.asarray(label)
    if label.dtype == jnp.bool_:
        label = label.astype(jnp.int32)

    n = int(label.shape[0])
    if n == 0:
        raise ValueError("ContrastiveLoss: empty batch (division by zero).")
    if int(dist.shape[0]) != n:
        raise ValueError(f"output/label length mismatch: {dist.shape[0]} vs {n}")

    if weight is None:
        w0, w1 = 1.0, 1.0
    else:
        w0, w1 = float(weight[0]), float(weight[1])

    sub_mult = max(_sublane_multiple(dist.dtype), _sublane_multiple(label.dtype))

    rows = _cdiv(n, _LANES)
    grid_steps = _cdiv(rows, max_block_rows)
    block_rows = _round_up(_cdiv(rows, grid_steps), sub_mult)

    if n == rows * _LANES:
        # Fast path: contiguous reshape only -- zero extra HBM traffic.
        if grid_steps == 1:
            block_rows = rows            # full-extent block: no tiling constraint
        padded_rows = grid_steps * block_rows
        dist2d = dist.reshape(rows, _LANES)
        label2d = label.reshape(rows, _LANES)
        mask_tail = padded_rows != rows  # partial last block -> mask in-kernel
        valid_rows = rows
    else:
        # General path: single minimal tail pad (worst case < block_rows +
        # sub_mult rows).  Pad with label=1 / dist=0: y*0^2 = 0 and
        # (1-y)*hinge^2 = 0 exactly, for any margin / weight / dtype.
        padded_rows = grid_steps * block_rows
        pad = padded_rows * _LANES - n
        dist2d = jnp.pad(dist, (0, pad)).reshape(padded_rows, _LANES)
        label2d = jnp.pad(label, (0, pad), constant_values=1).reshape(
            padded_rows, _LANES)
        mask_tail = False
        valid_rows = padded_rows

    kernel = functools.partial(
        _contrastive_loss_kernel,
        margin=float(margin), w0=w0, w1=w1,
        block_rows=block_rows, valid_rows=valid_rows, mask_tail=mask_tail)

    partials = pl.pallas_call(
        kernel,
        out_shape=jax.ShapeDtypeStruct((grid_steps, 1, 1), jnp.float32),
        grid=(grid_steps,),
        in_specs=[
            pl.BlockSpec((block_rows, _LANES), lambda i: (i, 0)),
            pl.BlockSpec((block_rows, _LANES), lambda i: (i, 0)),
        ],
        out_specs=pl.BlockSpec((None, 1, 1), lambda i: (i, 0, 0)),
        compiler_params=pltpu.CompilerParams(
            # Independent per-block partials -> parallel axis; row blocks shard
            # across both TensorCores on multi-TC chips (v7x).
            dimension_semantics=("parallel",),
            vmem_limit_bytes=32 * 1024 * 1024,
        ),
    )(dist2d, label2d)

    # Tiny (grid_steps-element) reduce + normalization outside the kernel.
    return jnp.sum(partials) * jnp.float32(0.5 / n)


def _reference_loss(output, label, *, margin=1.0, weight=None):
    dist = jnp.squeeze(jnp.asarray(output)).astype(jnp.float32)
    y = jnp.asarray(label).astype(jnp.float32)
    hinge = jnp.maximum(margin - dist, 0.0)
    loss_imposter = (1.0 - y) * hinge ** 2
    loss_genuine = y * dist ** 2
    if weight is not None:
        loss_imposter = loss_imposter * weight[0]
        loss_genuine = loss_genuine * weight[1]
    return jnp.sum(loss_genuine + loss_imposter) / 2.0 / label.shape[0]


if __name__ == "__main__":
    key = jax.random.PRNGKey(0)
    k1, k2, k3, k4 = jax.random.split(key, 4)

    # Case 1: tiny batch, (N, 1) distances (squeeze + tail-pad path).
    N1 = 8
    out1 = jnp.abs(jax.random.normal(k1, (N1, 1), dtype=jnp.float32)) * 1.5
    lab1 = (jax.random.uniform(k2, (N1,)) > 0.5).astype(jnp.int32)
    loss1 = jax.block_until_ready(contrastive_loss(out1, lab1, margin=1.0))
    ref1 = _reference_loss(out1, lab1, margin=1.0)
    assert jnp.allclose(loss1, ref1, rtol=1e-5, atol=1e-5), (loss1, ref1)

    # Case 2: lane-aligned batch -> zero-copy fast path, single full-extent
    # block, custom margin + class weights.
    N2 = 12 * 128
    out2 = jnp.abs(jax.random.normal(k3, (N2,), dtype=jnp.float32)) * 2.0
    lab2 = (jax.random.uniform(k4, (N2,)) > 0.5).astype(jnp.int32)
    w = (0.5, 2.0)
    loss2 = jax.block_until_ready(
        contrastive_loss(out2, lab2, margin=2.0, weight=w))
    ref2 = _reference_loss(out2, lab2, margin=2.0, weight=w)
    assert jnp.allclose(loss2, ref2, rtol=1e-5, atol=1e-5), (loss2, ref2)

    # Case 3: multi-step grid with a partial last block (in-kernel row mask),
    # forced via a small block height so the test stays tiny.
    loss3 = jax.block_until_ready(
        contrastive_loss(out2, lab2, margin=1.0, max_block_rows=8))
    ref3 = _reference_loss(out2, lab2, margin=1.0)
    assert jnp.allclose(loss3, ref3, rtol=1e-5, atol=1e-5), (loss3, ref3)

    # Case 4: bf16 distances enter the kernel natively and upcast in-kernel.
    out4 = out2[:1024].astype(jnp.bfloat16)
    lab4 = lab2[:1024]
    loss4 = jax.block_until_ready(contrastive_loss(out4, lab4, margin=1.0))
    ref4 = _reference_loss(out4, lab4, margin=1.0)
    assert jnp.allclose(loss4, ref4, rtol=1e-5, atol=1e-5), (loss4, ref4)

    print("KERNEL_OK")
</pallas_src>

<mosaic_0001>
module attributes {stable_mosaic.version = 11 : i64} {
  func.func @_contrastive_loss_kernel(%arg0: i32, %arg1: memref<8x128xf32, #tpu.memory_space<vmem>>, %arg2: memref<8x128xi32, #tpu.memory_space<vmem>>, %arg3: memref<1x1x1xf32, #tpu.memory_space<vmem>>) attributes {dimension_semantics = [#tpu.dimension_semantics<parallel>], iteration_bounds = array<i64: 1>, scalar_prefetch = 0 : i64, scratch_operands = 0 : i64, tpu.core_type = #tpu.core_type<tc>, window_params = [{transform_indices = @transform_0, window_bounds = array<i64: 8, 128>}, {transform_indices = @transform_1, window_bounds = array<i64: 8, 128>}, {transform_indices = @transform_2, window_bounds = array<i64: 1, 1, 1>}]} {
    %c0 = arith.constant 0 : index
    %c0_0 = arith.constant 0 : index
    %0 = vector.load %arg1[%c0, %c0_0] : memref<8x128xf32, #tpu.memory_space<vmem>>, vector<8x128xf32>
    %c0_1 = arith.constant 0 : index
    %c0_2 = arith.constant 0 : index
    %1 = vector.load %arg2[%c0_1, %c0_2] : memref<8x128xi32, #tpu.memory_space<vmem>>, vector<8x128xi32>
    %2 = arith.sitofp %1 : vector<8x128xi32> to vector<8x128xf32>
    %cst = arith.constant 1.000000e+00 : f32
    %3 = vector.broadcast %cst : f32 to vector<8x128xf32>
    %4 = arith.subf %3, %0 : vector<8x128xf32>
    %cst_3 = arith.constant 0.000000e+00 : f32
    %5 = vector.broadcast %cst_3 : f32 to vector<8x128xf32>
    %6 = arith.maximumf %4, %5 : vector<8x128xf32>
    %7 = arith.mulf %0, %0 : vector<8x128xf32>
    %8 = arith.mulf %2, %7 : vector<8x128xf32>
    %cst_4 = arith.constant 1.000000e+00 : f32
    %9 = vector.broadcast %cst_4 : f32 to vector<8x128xf32>
    %10 = arith.subf %9, %2 : vector<8x128xf32>
    %11 = arith.mulf %6, %6 : vector<8x128xf32>
    %12 = arith.mulf %10, %11 : vector<8x128xf32>
    %13 = arith.addf %8, %12 : vector<8x128xf32>
    %14 = vector.shape_cast %13 : vector<8x128xf32> to vector<1x8x128xf32>
    %cst_5 = arith.constant dense<0.000000e+00> : vector<1xf32>
    %15 = vector.multi_reduction <add>, %14, %cst_5 [1, 2] : vector<1x8x128xf32> to vector<1xf32>
    %16 = vector.shape_cast %15 : vector<1xf32> to vector<1x1x1xf32>
    %17 = vector.extract %16[0, 0, 0] : f32 from vector<1x1x1xf32>
    %18 = vector.broadcast %17 : f32 to vector<1x1xf32>
    %c0_6 = arith.constant 0 : index
    %c0_7 = arith.constant 0 : index
    %c0_8 = arith.constant 0 : index
    %19 = vector.load %arg3[%c0_6, %c0_7, %c0_8] : memref<1x1x1xf32, #tpu.memory_space<vmem>>, vector<1x1x1xf32>
    %20 = vector.shape_cast %19 : vector<1x1x1xf32> to vector<1x1xf32>
    %21 = vector.shape_cast %18 : vector<1x1xf32> to vector<1x1x1xf32>
    tpu.vector_store %arg3[%c0_6, %c0_7, %c0_8], %21 {strides = array<i32>} : memref<1x1x1xf32, #tpu.memory_space<vmem>>, vector<1x1x1xf32>,
    return
  }
  func.func @transform_0(%arg0: i32) -> (i32, i32) {
    %c0_i32 = arith.constant 0 : i32
    %c0_i32_0 = arith.constant 0 : i32
    return %arg0, %c0_i32 : i32, i32
  }
  func.func @transform_1(%arg0: i32) -> (i32, i32) {
    %c0_i32 = arith.constant 0 : i32
    %c0_i32_0 = arith.constant 0 : i32
    return %arg0, %c0_i32 : i32, i32
  }
  func.func @transform_2(%arg0: i32) -> (i32, i32, i32) {
    %c0_i32 = arith.constant 0 : i32
    %c0_i32_0 = arith.constant 0 : i32
    %c0_i32_1 = arith.constant 0 : i32
    return %arg0, %c0_i32, %c0_i32_0 : i32, i32, i32
  }
}

</mosaic_0001>

<bundles_post_ra>
// kernel: tpu_custom_call.1
= control target key start
LH: loop header
LB: loop body
LE: loop exit
PB: predicated region body
PF: predicated region fallthrough
CT: control target
= control target key end

     0   :  { %7 = vsyncpa [#allocation3], 0  ;;  %s206_s0 = inlined_call_operand.hbm [shape: f32[8,128], index: 0, kind: input, shape index: {}]   ;;  %s207_s1 = inlined_call_operand.hbm [shape: s32[8,128], index: 1, kind: input, shape index: {}]   ;;  %s208_s2 = inlined_call_operand.hbm [shape: f32[1,1,1], index: 2, kind: output, shape index: {}]  }
   0x1   :  { %8 = vsyncpa [#allocation6], 0 }
   0x2   :  { %9 = vsyncpa [#allocation4], 0  ;;  %s152_s9 = smov [#allocation2]   ;;  %s153_s11 = smov [#allocation5]  }
   0x3   :  { %s16_s10 = sshll.u32 %s152_s9, 4  ;;  %s26_s12 = sshll.u32 %s153_s11, 4  ;;  %s17_s10 = int_to_ptr.vmem [resolvable:$true] %s16_s10  ;;  %s27_s12 = int_to_ptr.vmem [resolvable:$true] %s26_s12 }
   0x4   :  { %s80_s15 = scalar_lea.hbm %s206_s0, 128 }
   0x5   :  { %p81_p0 = scmp.ne.s32.totalorder %s206_s0, %s80_s15  ;;  %p84_p1 = scmp.lt.u32.totalorder %s80_s15, %s206_s0 }
   0x7   :  { %p86_p2 = pnand %p84_p1, %p81_p0 }
   0x9   :  { %89 = shalt.err (!%p86_p2)
}
   0xa   :  { %s90_s20 = scalar_lea.vmem %s17_s10, 128  ;;  %p95_p4 = scmp.lt.s32.totalorder %s17_s10, %s17_s10 }
   0xb   :  { %p91_p3 = scmp.ne.s32.totalorder %s17_s10, %s90_s20  ;;  %p96_p5 = scmp.lt.s32.totalorder %s90_s20, %s90_s20 }
   0xd   :  { %p97_p6 = por %p96_p5, %p95_p4 }
   0xf   :  { %p98_p7 = pnand %p97_p6, %p91_p3 }
  0x11   :  { %101 = shalt.err (!%p98_p7)
}
  0x12   :  { %19 = dma.hbm_to_vmem [thread:$0]  %s206_s0, 128, %s17_s10, [#allocation3]  }
  0x13   :  { %s102_s25 = scalar_lea.hbm %s207_s1, 128 }
  0x14   :  { %p103_p8 = scmp.ne.s32.totalorder %s207_s1, %s102_s25  ;;  %p106_p9 = scmp.lt.u32.totalorder %s102_s25, %s207_s1 }
  0x16   :  { %p108_p10 = pnand %p106_p9, %p103_p8 }
  0x18   :  { %111 = shalt.err (!%p108_p10)
}
  0x19   :  { %s112_s30 = scalar_lea.vmem %s27_s12, 128  ;;  %p117_p12 = scmp.lt.s32.totalorder %s27_s12, %s27_s12 }
  0x1a   :  { %p113_p11 = scmp.ne.s32.totalorder %s27_s12, %s112_s30  ;;  %p118_p13 = scmp.lt.s32.totalorder %s112_s30, %s112_s30 }
  0x1c   :  { %p119_p0 = por %p118_p13, %p117_p12 }
  0x1e   :  { %p120_p1 = pnand %p119_p0, %p113_p11 }
  0x20   :  { %123 = shalt.err (!%p120_p1)
}
  0x21   :  { %29 = dma.hbm_to_vmem [thread:$0]  %s207_s1, 128, %s27_s12, [#allocation6]  }
  0x22   :  { %146 = dma.done.wait [#allocation3], 128  }
  0x23   :  { %147 = vsyncadd [#allocation3], 4294967168 }
  0x24   :  { %148 = dma.done.wait [#allocation6], 128  }
  0x25   :  { %149 = vsyncadd [#allocation6], 4294967168  ;;  %v36_v0 = vld [vmem:[#allocation2] sm:$0xff]  ;;  %v37_v1 = vld [vmem:[#allocation5] sm:$0xff]  ;;  %s154_s1 = smov [#allocation7]   ;;  %vm57_vm0 = vcmask 0  }
  0x26   :  { %v38_v2 = vcvt.s32.f32 %v37_v1  ;;  %v39_v3 = vsub.f32 1.0, %v36_v0  ;;  %v41_v4 = vmul.f32 %v36_v0, %v36_v0  ;;  %s65_s4 = sshll.u32 %s154_s1, 4  ;;  %s66_s4 = int_to_ptr.vmem [resolvable:$true] %s65_s4 }
  0x27   :  { %s124_s6 = scalar_lea.vmem %s66_s4, 16  ;;  %s128_s7 = scalar_lea.vmem %s66_s4, 32 }
  0x28   :  { %v40_v5 = vmax.f32 %v39_v3, 0.0  ;;  %v43_v6 = vsub.f32 1.0, %v38_v2  ;;  %v42_v7 = vmul.f32 %v41_v4, %v38_v2  ;;  %p125_p2 = scmp.ne.s32.totalorder %s66_s4, %s124_s6  ;;  %p129_p3 = scmp.lt.s32.totalorder %s66_s4, %s66_s4 }
  0x29   :  { %p130_p4 = scmp.lt.s32.totalorder %s128_s7, %s124_s6 }
  0x2a   :  { %v44_v8 = vmul.f32 %v40_v5, %v40_v5 }
  0x2b   :  { %p131_p5 = por %p130_p4, %p129_p3 }
  0x2c   :  { %v45_v9 = vmul.f32 %v44_v8, %v43_v6 }
  0x2d   :  { %p132_p6 = pnand %p131_p5, %p125_p2 }
  0x2e   :  { %v46_v10 = vadd.f32 %v45_v9, %v42_v7 }
  0x30   :  { %47 = vadd.xlane.f32.xlu0 %v46_v10 }
  0xbd   :  { %v48_v11 = vpop.xlane.xlu0 %47 }
  0xbe   :  { %v49_v12 = vrot.slane %v48_v11, 4 }
  0xc0   :  { %v50_v13 = vadd.f32 %v49_v12, %v48_v11 }
  0xc2   :  { %v51_v14 = vrot.slane %v50_v13, 2 }
  0xc4   :  { %v52_v15 = vadd.f32 %v51_v14, %v50_v13 }
  0xc6   :  { %v53_v16 = vrot.slane %v52_v15, 1 }
  0xc8   :  { %v54_v17 = vadd.f32 %v53_v16, %v52_v15 }
  0xca   :  { %75 = vpush %v54_v17 }
  0xfb   :  { %s76_s5 = spop %75 }
  0xfc   :  { %v56_v18 = vstv %s76_s5 }
  0xfd   :  { %58 = vst.msk [vmem:[#allocation7] sm:$0x1] %vm57_vm0, %v56_v18 }
  0xfe   :  { %135 = shalt.err (!%p132_p6)
}
  0xff   :  { %s136_s10 = scalar_lea.hbm %s208_s2, 16 }
 0x100   :  { %p137_p7 = scmp.ne.s32.totalorder %s208_s2, %s136_s10  ;;  %p140_p8 = scmp.lt.u32.totalorder %s136_s10, %s208_s2 }
 0x102   :  { %p142_p9 = pnand %p140_p8, %p137_p7 }
 0x104   :  { %145 = shalt.err (!%p142_p9)
}
 0x105   :  { %68 = dma.vmem_to_hbm [thread:$0]  %s66_s4, 16, %s208_s2, [#allocation4]  }
 0x106   :  { %150 = dma.done.wait [#allocation4], 16  }
 0x107   :  { %151 = vsyncadd [#allocation4], 4294967280 }
 0x108   :  { %72 = vsyncpa [#allocation3], 1 }
 0x109   :  { %73 = vsyncpa [#allocation6], 1 }
 0x10a   :  { %74 = vsyncpa [#allocation4], 1 }

</bundles_post_ra>
